<compile_context>
chip_gen: v7x
topology: tpu7x:2x2x1
jax: 0.10.0
libtpu: 0.0.40
codegen_flags: <defaults>
</compile_context>

<pallas_src>
import functools

import jax
import jax.numpy as jnp
from jax.experimental import pallas as pl
from jax.experimental.pallas import tpu as pltpu

_LANE = 128


def _round_up(n, m):
    return ((n + m - 1) // m) * m


def _discriminator_kernel(x_ref,
                          w1_ref, b1_ref,
                          w2_ref, b2_ref,
                          w3_ref, b3_ref,
                          w4_ref, b4_ref,
                          o_ref,
                          *, is_wgan: bool):
    # Cast the f32 batch tile to bf16 in-kernel (cheap VPU op, avoids a
    # separate wrapper-side cast pass through HBM).
    x = x_ref[...].astype(jnp.bfloat16)
    # fc1 + ReLU  (bf16 MXU inputs, f32 accumulate / epilogue)
    h = jnp.dot(x, w1_ref[...], preferred_element_type=jnp.float32)
    h = jnp.maximum(h + b1_ref[...], 0.0)
    # fc2 + ReLU
    h = jnp.dot(h.astype(w2_ref.dtype), w2_ref[...],
                preferred_element_type=jnp.float32)
    h = jnp.maximum(h + b2_ref[...], 0.0)
    # fc3 + ReLU
    h = jnp.dot(h.astype(w3_ref.dtype), w3_ref[...],
                preferred_element_type=jnp.float32)
    h = jnp.maximum(h + b3_ref[...], 0.0)
    # fc4 (out_features == 1): VPU multiply + lane reduction; head bias is an
    # SMEM scalar.  Result is a true [tb, 1] column (no lane broadcast).
    out = jnp.sum(h * w4_ref[...], axis=-1, keepdims=True) + b4_ref[0, 0]
    if not is_wgan:
        out = jax.nn.sigmoid(out)
    o_ref[...] = out.astype(o_ref.dtype)


def prepare_params(params):
    """One-time padding / dtype prep of the weights (call once, reuse per step).

    Hidden dims are zero-padded to multiples of 128 so every in-kernel tile is
    lane-aligned; padded bias columns are 0 so ReLU keeps padded activation
    columns at exactly 0 (zero contribution downstream).
    """
    f1d = params["w1"].shape[1]
    f2d = params["w2"].shape[1]
    f3d = params["w3"].shape[1]
    f1p, f2p, f3p = (_round_up(d, _LANE) for d in (f1d, f2d, f3d))
    return {
        "w1": jnp.pad(params["w1"], ((0, 0), (0, f1p - f1d))).astype(jnp.bfloat16),
        "b1": jnp.pad(params["b1"], ((0, 0), (0, f1p - f1d))),
        "w2": jnp.pad(params["w2"], ((0, f1p - f1d), (0, f2p - f2d))).astype(jnp.bfloat16),
        "b2": jnp.pad(params["b2"], ((0, 0), (0, f2p - f2d))),
        "w3": jnp.pad(params["w3"], ((0, f2p - f2d), (0, f3p - f3d))).astype(jnp.bfloat16),
        "b3": jnp.pad(params["b3"], ((0, 0), (0, f3p - f3d))),
        # Head as a broadcast row (f32, used on the VPU) + scalar bias (SMEM).
        "w4row": jnp.pad(params["w4"].reshape(1, -1), ((0, 0), (0, f3p - f3d))),
        "b4": params["b4"].reshape(1, 1),
    }


def _choose_batch_tile(B, tile_b):
    """Batch tile: multiple of 8 sublanes, capped at tile_b; ensure >= 2 grid
    steps whenever possible so the 'parallel' axis can shard over v7x's 2 TCs."""
    tb = min(tile_b, _round_up(B, 8))
    if B > 8 and pl.cdiv(B, tb) < 2:
        tb = _round_up(pl.cdiv(B, 2), 8)
    return tb


def discriminator_forward(x, prep, *, is_wgan=True, tile_b=2048):
    """Fused MLP Discriminator forward pass.

    x:    [B, latent_dim] float32
    prep: output of prepare_params() (padded bf16 weights, f32 biases)
    returns: [B, 1] float32
    """
    B, ld = x.shape
    w1, b1 = prep["w1"], prep["b1"]
    w2, b2 = prep["w2"], prep["b2"]
    w3, b3 = prep["w3"], prep["b3"]
    w4row, b4 = prep["w4row"], prep["b4"]
    f1p, f2p, f3p = w1.shape[1], w2.shape[1], w3.shape[1]

    tb = _choose_batch_tile(B, tile_b)
    # No round-up of B to a multiple of tb: last tile may be partial (masked
    # load/store), so no wasted rows / DMA.
    grid = (pl.cdiv(B, tb),)

    out = pl.pallas_call(
        functools.partial(_discriminator_kernel, is_wgan=is_wgan),
        out_shape=jax.ShapeDtypeStruct((B, 1), jnp.float32),
        grid=grid,
        in_specs=[
            pl.BlockSpec((tb, ld), lambda i: (i, 0)),      # x: batch-tiled, f32
            pl.BlockSpec((ld, f1p), lambda i: (0, 0)),     # weights/biases:
            pl.BlockSpec((1, f1p), lambda i: (0, 0)),      #   constant index ->
            pl.BlockSpec((f1p, f2p), lambda i: (0, 0)),    #   DMA'd once, VMEM
            pl.BlockSpec((1, f2p), lambda i: (0, 0)),      #   resident across
            pl.BlockSpec((f2p, f3p), lambda i: (0, 0)),    #   all grid steps
            pl.BlockSpec((1, f3p), lambda i: (0, 0)),
            pl.BlockSpec((1, f3p), lambda i: (0, 0)),      # head row (f32, VPU)
            pl.BlockSpec(memory_space=pltpu.MemorySpace.SMEM),  # b4 scalar
        ],
        out_specs=pl.BlockSpec((tb, 1), lambda i: (i, 0)),  # true [B,1] column
        compiler_params=pltpu.CompilerParams(
            dimension_semantics=("parallel",)),
    )(x, w1, b1, w2, b2, w3, b3, w4row, b4)

    return out


def init_params(key, ld, f1d, f2d, f3d):
    """Deterministic synthetic init (PyTorch nn.Linear default-style uniform)."""
    dims = [(ld, f1d), (f1d, f2d), (f2d, f3d), (f3d, 1)]
    params = {}
    for i, (fan_in, fan_out) in enumerate(dims, start=1):
        key, kw, kb = jax.random.split(key, 3)
        bound = 1.0 / jnp.sqrt(float(fan_in))
        # Stored pre-transposed to [in, out] for the kernel.
        params[f"w{i}"] = jax.random.uniform(
            kw, (fan_in, fan_out), jnp.float32, -bound, bound)
        params[f"b{i}"] = jax.random.uniform(
            kb, (1, fan_out), jnp.float32, -bound, bound)
    return params


def reference_forward(x, params, *, is_wgan=True):
    """Pure-f32 reference matching the PyTorch module."""
    h = jnp.maximum(x @ params["w1"] + params["b1"], 0.0)
    h = jnp.maximum(h @ params["w2"] + params["b2"], 0.0)
    h = jnp.maximum(h @ params["w3"] + params["b3"], 0.0)
    out = h @ params["w4"] + params["b4"]
    return out if is_wgan else jax.nn.sigmoid(out)


def reference_forward_bf16(x, params, *, is_wgan=True):
    """Reference with the same bf16-input / f32-accumulate matmuls and f32
    VPU-style head reduction as the kernel."""
    def mm(a, w):
        return jnp.dot(a.astype(jnp.bfloat16), w.astype(jnp.bfloat16),
                       preferred_element_type=jnp.float32)
    h = jnp.maximum(mm(x, params["w1"]) + params["b1"], 0.0)
    h = jnp.maximum(mm(h, params["w2"]) + params["b2"], 0.0)
    h = jnp.maximum(mm(h, params["w3"]) + params["b3"], 0.0)
    out = jnp.sum(h * params["w4"].reshape(1, -1), axis=-1, keepdims=True)
    out = out + params["b4"]
    return out if is_wgan else jax.nn.sigmoid(out)


if __name__ == "__main__":
    key = jax.random.PRNGKey(0)
    ld, f1d, f2d, f3d = 32, 64, 48, 32

    kx, kp = jax.random.split(key)
    params = init_params(kp, ld, f1d, f2d, f3d)
    prep = prepare_params(params)   # one-time weight padding / casting

    # batch=8: single full tile.  batch=520: >= 2 grid steps (v7x megacore
    # path) with a partial last tile (no Bp round-up to the tile size).
    for batch in (8, 520):
        x = jax.random.normal(jax.random.fold_in(kx, batch), (batch, ld),
                              jnp.float32)
        for is_wgan in (True, False):
            out = discriminator_forward(x, prep, is_wgan=is_wgan)
            out = jax.block_until_ready(out)
            assert out.shape == (batch, 1)

            ref_bf16 = reference_forward_bf16(x, params, is_wgan=is_wgan)
            ref_f32 = reference_forward(x, params, is_wgan=is_wgan)
            # Tight check against a reference using the same bf16-input matmuls
            # and f32 head reduction as the kernel.
            assert jnp.allclose(out, ref_bf16, atol=2e-3, rtol=2e-3), (
                batch, is_wgan, jnp.max(jnp.abs(out - ref_bf16)))
            # Loose check against the full-f32 PyTorch-equivalent reference
            # (difference is only the bf16 MXU-input quantization).
            assert jnp.allclose(out, ref_f32, atol=5e-2, rtol=5e-2), (
                batch, is_wgan, jnp.max(jnp.abs(out - ref_f32)))

    print("KERNEL_OK")
</pallas_src>

<mosaic_0001>
module attributes {stable_mosaic.version = 11 : i64} {
  func.func @_discriminator_kernel(%arg0: i32, %arg1: memref<8x32xf32, #tpu.memory_space<vmem>>, %arg2: memref<32x128xbf16, #tpu.memory_space<vmem>>, %arg3: memref<1x128xf32, #tpu.memory_space<vmem>>, %arg4: memref<128x128xbf16, #tpu.memory_space<vmem>>, %arg5: memref<1x128xf32, #tpu.memory_space<vmem>>, %arg6: memref<128x128xbf16, #tpu.memory_space<vmem>>, %arg7: memref<1x128xf32, #tpu.memory_space<vmem>>, %arg8: memref<1x128xf32, #tpu.memory_space<vmem>>, %arg9: memref<1x1xf32, #tpu.memory_space<smem>>, %arg10: memref<8x1xf32, #tpu.memory_space<vmem>>) attributes {dimension_semantics = [#tpu.dimension_semantics<parallel>], iteration_bounds = array<i64: 1>, scalar_prefetch = 0 : i64, scratch_operands = 0 : i64, tpu.core_type = #tpu.core_type<tc>, window_params = [{transform_indices = @transform_0, window_bounds = array<i64: 8, 32>}, {pipeline_mode = #tpu.pipeline_mode<synchronous>, transform_indices = @transform_1, window_bounds = array<i64: 32, 128>}, {pipeline_mode = #tpu.pipeline_mode<synchronous>, transform_indices = @transform_2, window_bounds = array<i64: 1, 128>}, {pipeline_mode = #tpu.pipeline_mode<synchronous>, transform_indices = @transform_3, window_bounds = array<i64: 128, 128>}, {pipeline_mode = #tpu.pipeline_mode<synchronous>, transform_indices = @transform_4, window_bounds = array<i64: 1, 128>}, {pipeline_mode = #tpu.pipeline_mode<synchronous>, transform_indices = @transform_5, window_bounds = array<i64: 128, 128>}, {pipeline_mode = #tpu.pipeline_mode<synchronous>, transform_indices = @transform_6, window_bounds = array<i64: 1, 128>}, {pipeline_mode = #tpu.pipeline_mode<synchronous>, transform_indices = @transform_7, window_bounds = array<i64: 1, 128>}, {transform_indices = @transform_8, window_bounds = array<i64: 1, 1>}, {transform_indices = @transform_9, window_bounds = array<i64: 8, 1>}]} {
    %c0 = arith.constant 0 : index
    %c0_0 = arith.constant 0 : index
    %0 = vector.load %arg1[%c0, %c0_0] : memref<8x32xf32, #tpu.memory_space<vmem>>, vector<8x32xf32>
    %1 = arith.truncf %0 : vector<8x32xf32> to vector<8x32xbf16>
    %c0_1 = arith.constant 0 : index
    %c0_2 = arith.constant 0 : index
    %2 = vector.load %arg2[%c0_1, %c0_2] : memref<32x128xbf16, #tpu.memory_space<vmem>>, vector<32x128xbf16>
    %cst = arith.constant dense<0.000000e+00> : vector<8x128xf32>
    %3 = tpu.matmul %1, %2, %cst {dimension_numbers = #tpu.dot_dimension_numbers<[1], [0], [0], [1], [0, 0, 1, 1], [], []>} : vector<8x32xbf16>, vector<32x128xbf16>, vector<8x128xf32> -> vector<8x128xf32>
    %c0_3 = arith.constant 0 : index
    %c0_4 = arith.constant 0 : index
    %4 = vector.load %arg3[%c0_3, %c0_4] : memref<1x128xf32, #tpu.memory_space<vmem>>, vector<1x128xf32>
    %5 = vector.broadcast %4 : vector<1x128xf32> to vector<8x128xf32>
    %6 = arith.addf %3, %5 : vector<8x128xf32>
    %cst_5 = arith.constant 0.000000e+00 : f32
    %7 = vector.broadcast %cst_5 : f32 to vector<8x128xf32>
    %8 = arith.maximumf %6, %7 : vector<8x128xf32>
    %9 = arith.truncf %8 : vector<8x128xf32> to vector<8x128xbf16>
    %c0_6 = arith.constant 0 : index
    %c0_7 = arith.constant 0 : index
    %10 = vector.load %arg4[%c0_6, %c0_7] : memref<128x128xbf16, #tpu.memory_space<vmem>>, vector<128x128xbf16>
    %cst_8 = arith.constant dense<0.000000e+00> : vector<8x128xf32>
    %11 = tpu.matmul %9, %10, %cst_8 {dimension_numbers = #tpu.dot_dimension_numbers<[1], [0], [0], [1], [0, 0, 1, 1], [], []>} : vector<8x128xbf16>, vector<128x128xbf16>, vector<8x128xf32> -> vector<8x128xf32>
    %c0_9 = arith.constant 0 : index
    %c0_10 = arith.constant 0 : index
    %12 = vector.load %arg5[%c0_9, %c0_10] : memref<1x128xf32, #tpu.memory_space<vmem>>, vector<1x128xf32>
    %13 = vector.broadcast %12 : vector<1x128xf32> to vector<8x128xf32>
    %14 = arith.addf %11, %13 : vector<8x128xf32>
    %cst_11 = arith.constant 0.000000e+00 : f32
    %15 = vector.broadcast %cst_11 : f32 to vector<8x128xf32>
    %16 = arith.maximumf %14, %15 : vector<8x128xf32>
    %17 = arith.truncf %16 : vector<8x128xf32> to vector<8x128xbf16>
    %c0_12 = arith.constant 0 : index
    %c0_13 = arith.constant 0 : index
    %18 = vector.load %arg6[%c0_12, %c0_13] : memref<128x128xbf16, #tpu.memory_space<vmem>>, vector<128x128xbf16>
    %cst_14 = arith.constant dense<0.000000e+00> : vector<8x128xf32>
    %19 = tpu.matmul %17, %18, %cst_14 {dimension_numbers = #tpu.dot_dimension_numbers<[1], [0], [0], [1], [0, 0, 1, 1], [], []>} : vector<8x128xbf16>, vector<128x128xbf16>, vector<8x128xf32> -> vector<8x128xf32>
    %c0_15 = arith.constant 0 : index
    %c0_16 = arith.constant 0 : index
    %20 = vector.load %arg7[%c0_15, %c0_16] : memref<1x128xf32, #tpu.memory_space<vmem>>, vector<1x128xf32>
    %21 = vector.broadcast %20 : vector<1x128xf32> to vector<8x128xf32>
    %22 = arith.addf %19, %21 : vector<8x128xf32>
    %cst_17 = arith.constant 0.000000e+00 : f32
    %23 = vector.broadcast %cst_17 : f32 to vector<8x128xf32>
    %24 = arith.maximumf %22, %23 : vector<8x128xf32>
    %c0_18 = arith.constant 0 : index
    %c0_19 = arith.constant 0 : index
    %25 = vector.load %arg8[%c0_18, %c0_19] : memref<1x128xf32, #tpu.memory_space<vmem>>, vector<1x128xf32>
    %26 = vector.broadcast %25 : vector<1x128xf32> to vector<8x128xf32>
    %27 = arith.mulf %24, %26 : vector<8x128xf32>
    %cst_20 = arith.constant dense<0.000000e+00> : vector<8xf32>
    %28 = vector.multi_reduction <add>, %27, %cst_20 [1] : vector<8x128xf32> to vector<8xf32>
    %29 = vector.shape_cast %28 : vector<8xf32> to vector<8x1xf32>
    %c0_21 = arith.constant 0 : index
    %c0_22 = arith.constant 0 : index
    %30 = memref.load %arg9[%c0_21, %c0_22] : memref<1x1xf32, #tpu.memory_space<smem>>
    %31 = vector.broadcast %30 : f32 to vector<8x1xf32>
    %32 = arith.addf %29, %31 : vector<8x1xf32>
    %c0_23 = arith.constant 0 : index
    %c0_24 = arith.constant 0 : index
    %33 = vector.load %arg10[%c0_23, %c0_24] : memref<8x1xf32, #tpu.memory_space<vmem>>, vector<8x1xf32>
    tpu.vector_store %arg10[%c0_23, %c0_24], %32 {strides = array<i32>} : memref<8x1xf32, #tpu.memory_space<vmem>>, vector<8x1xf32>,
    return
  }
  func.func @transform_0(%arg0: i32) -> (i32, i32) {
    %c0_i32 = arith.constant 0 : i32
    %c0_i32_0 = arith.constant 0 : i32
    return %arg0, %c0_i32 : i32, i32
  }
  func.func @transform_1(%arg0: i32) -> (i32, i32) {
    %c0_i32 = arith.constant 0 : i32
    %c0_i32_0 = arith.constant 0 : i32
    %c0_i32_1 = arith.constant 0 : i32
    return %c0_i32, %c0_i32_0 : i32, i32
  }
  func.func @transform_2(%arg0: i32) -> (i32, i32) {
    %c0_i32 = arith.constant 0 : i32
    %c0_i32_0 = arith.constant 0 : i32
    %c0_i32_1 = arith.constant 0 : i32
    return %c0_i32, %c0_i32_0 : i32, i32
  }
  func.func @transform_3(%arg0: i32) -> (i32, i32) {
    %c0_i32 = arith.constant 0 : i32
    %c0_i32_0 = arith.constant 0 : i32
    %c0_i32_1 = arith.constant 0 : i32
    return %c0_i32, %c0_i32_0 : i32, i32
  }
  func.func @transform_4(%arg0: i32) -> (i32, i32) {
    %c0_i32 = arith.constant 0 : i32
    %c0_i32_0 = arith.constant 0 : i32
    %c0_i32_1 = arith.constant 0 : i32
    return %c0_i32, %c0_i32_0 : i32, i32
  }
  func.func @transform_5(%arg0: i32) -> (i32, i32) {
    %c0_i32 = arith.constant 0 : i32
    %c0_i32_0 = arith.constant 0 : i32
    %c0_i32_1 = arith.constant 0 : i32
    return %c0_i32, %c0_i32_0 : i32, i32
  }
  func.func @transform_6(%arg0: i32) -> (i32, i32) {
    %c0_i32 = arith.constant 0 : i32
    %c0_i32_0 = arith.constant 0 : i32
    %c0_i32_1 = arith.constant 0 : i32
    return %c0_i32, %c0_i32_0 : i32, i32
  }
  func.func @transform_7(%arg0: i32) -> (i32, i32) {
    %c0_i32 = arith.constant 0 : i32
    %c0_i32_0 = arith.constant 0 : i32
    %c0_i32_1 = arith.constant 0 : i32
    return %c0_i32, %c0_i32_0 : i32, i32
  }
  func.func @transform_8(%arg0: i32) -> (i32, i32) {
    %c0_i32 = arith.constant 0 : i32
    %c0_i32_0 = arith.constant 0 : i32
    %c0_i32_1 = arith.constant 0 : i32
    return %c0_i32, %c0_i32_0 : i32, i32
  }
  func.func @transform_9(%arg0: i32) -> (i32, i32) {
    %c0_i32 = arith.constant 0 : i32
    %c0_i32_0 = arith.constant 0 : i32
    return %arg0, %c0_i32 : i32, i32
  }
}

</mosaic_0001>

<bundles_post_ra>
// kernel: tpu_custom_call.1
= control target key start
LH: loop header
LB: loop body
LE: loop exit
PB: predicated region body
PF: predicated region fallthrough
CT: control target
= control target key end

     0   :  { %15 = vsyncpa [#allocation4], 0  ;;  %s774_s0 = inlined_call_operand.hbm [shape: f32[8,32], index: 0, kind: input, shape index: {}]   ;;  %s775_s1 = inlined_call_operand.hbm [shape: bf16[32,128], index: 1, kind: input, shape index: {}]   ;;  %s776_s2 = inlined_call_operand.vmem [shape: f32[1,128], index: 2, kind: input, shape index: {}]   ;;  %s777_s3 = inlined_call_operand.hbm [shape: bf16[128,128], index: 3, kind: input, shape index: {}]   ;;  %s778_s4 = inlined_call_operand.vmem [shape: f32[1,128], index: 4, kind: input, shape index: {}]   ;;  %s779_s5 = inlined_call_operand.hbm [shape: bf16[128,128], index: 5, kind: input, shape index: {}]   ;;  %s780_s6 = inlined_call_operand.vmem [shape: f32[1,128], index: 6, kind: input, shape index: {}]   ;;  %s781_s7 = inlined_call_operand.vmem [shape: f32[1,128], index: 7, kind: input, shape index: {}]   ;;  %s782_s8 = inlined_call_operand.<no memory space> [shape: f32[1,1], index: 8, kind: input, shape index: {}]   ;;  %s783_s9 = inlined_call_operand.vmem [shape: f32[8,1], index: 9, kind: output, shape index: {}]  }
   0x1   :  { %16 = vsyncpa [#allocation6], 0 }
   0x2   :  { %17 = vsyncpa [#allocation9], 0  ;;  %s617_s30 = smov [#allocation5]   ;;  %s523_s13 = scalar_lea.hbm %s775_s1, 256 }
   0x3   :  { %s33_s10 = sshll.u32 %s617_s30, 4  ;;  %p524_p0 = scmp.ne.s32.totalorder %s775_s1, %s523_s13  ;;  %s34_s10 = int_to_ptr.vmem [resolvable:$true] %s33_s10 }
   0x4   :  { %p527_p1 = scmp.lt.u32.totalorder %s523_s13, %s775_s1 }
   0x6   :  { %p529_p2 = pnand %p527_p1, %p524_p0 }
   0x8   :  { %532 = shalt.err (!%p529_p2)
}
   0x9   :  { %s533_s18 = scalar_lea.vmem %s34_s10, 256  ;;  %p538_p4 = scmp.lt.s32.totalorder %s34_s10, %s34_s10 }
   0xa   :  { %p534_p3 = scmp.ne.s32.totalorder %s34_s10, %s533_s18  ;;  %p539_p5 = scmp.lt.s32.totalorder %s533_s18, %s533_s18 }
   0xc   :  { %p540_p6 = por %p539_p5, %p538_p4 }
   0xe   :  { %p541_p7 = pnand %p540_p6, %p534_p3 }
  0x10   :  { %544 = shalt.err (!%p541_p7)
}
  0x11   :  { %s618_s19 = smov 64   ;;  %s619_s20 = smov 4  }
  0x12   :  { %39 = dma.hbm_to_vmem [thread:$0]  %s775_s1, 256, %s34_s10, [#allocation6], %s618_s19, %s618_s19, %s619_s20  }
  0x13   :  { %s620_s23 = smov [#allocation3]   ;;  %s621_s25 = smov [#allocation7]  }
  0x14   :  { %s24_s24 = sshll.u32 %s620_s23, 4  ;;  %s47_s26 = sshll.u32 %s621_s25, 4  ;;  %s25_s24 = int_to_ptr.vmem [resolvable:$true] %s24_s24  ;;  %s48_s26 = int_to_ptr.vmem [resolvable:$true] %s47_s26 }
  0x15   :  { %s545_s29 = scalar_lea.hbm %s774_s0, 128 }
  0x16   :  { %p546_p8 = scmp.ne.s32.totalorder %s774_s0, %s545_s29  ;;  %p549_p9 = scmp.lt.u32.totalorder %s545_s29, %s774_s0 }
  0x18   :  { %p551_p10 = pnand %p549_p9, %p546_p8 }
  0x1a   :  { %554 = shalt.err (!%p551_p10)
}
  0x1b   :  { %s555_s1 = scalar_lea.vmem %s25_s24, 128  ;;  %p560_p12 = scmp.lt.s32.totalorder %s25_s24, %s25_s24 }
  0x1c   :  { %p556_p11 = scmp.ne.s32.totalorder %s25_s24, %s555_s1  ;;  %p561_p13 = scmp.lt.s32.totalorder %s555_s1, %s555_s1 }
  0x1e   :  { %p562_p0 = por %p561_p13, %p560_p12 }
  0x20   :  { %p563_p1 = pnand %p562_p0, %p556_p11 }
  0x22   :  { %566 = shalt.err (!%p563_p1)
}
  0x23   :  { %27 = dma.hbm_to_vmem [thread:$0]  %s774_s0, 128, %s25_s24, [#allocation4]  }
  0x24   :  { %s567_s17 = scalar_lea.hbm %s777_s3, 1024 }
  0x25   :  { %p568_p2 = scmp.ne.s32.totalorder %s777_s3, %s567_s17  ;;  %p571_p3 = scmp.lt.u32.totalorder %s567_s17, %s777_s3 }
  0x27   :  { %p573_p4 = pnand %p571_p3, %p568_p2 }
  0x29   :  { %576 = shalt.err (!%p573_p4)
}
  0x2a   :  { %s577_s25 = scalar_lea.vmem %s48_s26, 1024  ;;  %p582_p6 = scmp.lt.s32.totalorder %s48_s26, %s48_s26 }
  0x2b   :  { %p578_p5 = scmp.ne.s32.totalorder %s48_s26, %s577_s25  ;;  %p583_p7 = scmp.lt.s32.totalorder %s577_s25, %s577_s25 }
  0x2d   :  { %p584_p8 = por %p583_p7, %p582_p6 }
  0x2f   :  { %p585_p9 = pnand %p584_p8, %p578_p5 }
  0x31   :  { %588 = shalt.err (!%p585_p9)
}
  0x32   :  { %53 = dma.hbm_to_vmem [thread:$0]  %s777_s3, 1024, %s48_s26, [#allocation6], %s618_s19, %s618_s19, %s619_s20  }
  0x33   :  { %s622_s27 = smov [#allocation8]   ;;  %s589_s11 = scalar_lea.hbm %s779_s5, 1024 }
  0x34   :  { %s61_s28 = sshll.u32 %s622_s27, 4  ;;  %p590_p10 = scmp.ne.s32.totalorder %s779_s5, %s589_s11  ;;  %s62_s28 = int_to_ptr.vmem [resolvable:$true] %s61_s28 }
  0x35   :  { %p593_p11 = scmp.lt.u32.totalorder %s589_s11, %s779_s5 }
  0x37   :  { %p595_p12 = pnand %p593_p11, %p590_p10 }
  0x39   :  { %598 = shalt.err (!%p595_p12)
}
  0x3a   :  { %s599_s14 = scalar_lea.vmem %s62_s28, 1024  ;;  %p604_p0 = scmp.lt.s32.totalorder %s62_s28, %s62_s28 }
  0x3b   :  { %p600_p13 = scmp.ne.s32.totalorder %s62_s28, %s599_s14  ;;  %p605_p1 = scmp.lt.s32.totalorder %s599_s14, %s599_s14 }
  0x3d   :  { %p606_p2 = por %p605_p1, %p604_p0 }
  0x3f   :  { %p607_p3 = pnand %p606_p2, %p600_p13 }
  0x41   :  { %610 = shalt.err (!%p607_p3)
}
  0x42   :  { %67 = dma.hbm_to_vmem [thread:$0]  %s779_s5, 1024, %s62_s28, [#allocation9], %s618_s19, %s618_s19, %s619_s20  }
  0x43   :  { %611 = dma.done.wait [#allocation4], 128  }
  0x44   :  { %612 = vsyncadd [#allocation4], 4294967168 }
  0x45   :  { %613 = dma.done.wait [#allocation6], 1280  }
  0x46   :  { %614 = vsyncadd [#allocation6], 4294966016 }
  0x47   :  { %615 = dma.done.wait [#allocation9], 1024  }
  0x48   :  { %616 = vsyncadd [#allocation9], 4294966272  ;;  %v623_v0 = vmov 0.0   ;;  %vm624_vm0 = vmmov 0   ;;  %v505_v1 = vld [vmem:[#allocation5] sm:$0xff]   ;;  %v506_v2 = vld [vmem:[#allocation5 + $0x8] sm:$0xff]   ;;  %v394_v46 = vstv %s782_s8 }
  0x49   :  { %449 = vmatprep.subr.bf16.mxu0 %v623_v0  ;;  %453 = vmatprep.mubr.msk.bf16.mxu0 %vm624_vm0, %v623_v0  ;;  %v87_v3 = vld [vmem:[#allocation3] sm:$0xff]  ;;  %v507_v4 = vld [vmem:[#allocation7] sm:$0xff]   ;;  %vm112_vm1 = vcmask 261120   ;;  %v509_v7 = vld [vmem:[#allocation7 + $0x10] sm:$0xff]   ;;  %vm396_vm2 = vcmask 7168  }
  0x4a   :  { %457 = vmatprep.subr.bf16.mxu1 %v623_v0  ;;  %473 = vmatprep.mubr.msk.bf16.mxu1 %vm624_vm0, %v623_v0  ;;  %v88_v5 = vpack.c.bf16 %v87_v3, %v87_v3  ;;  %v508_v6 = vld [vmem:[#allocation7 + $0x8] sm:$0xff]   ;;  %v510_v8 = vld [vmem:[#allocation7 + $0x18] sm:$0xff]   ;;  %v511_v9 = vld [vmem:[#allocation7 + $0x20] sm:$0xff]  }
  0x4b   :  { %450 = vmatpush3.bf16.msra.mxu0 %v505_v1  ;;  %458 = vmatpush3.bf16.msra.mxu1 %v507_v4  ;;  %v512_v10 = vld [vmem:[#allocation7 + $0x28] sm:$0xff]   ;;  %v513_v11 = vld [vmem:[#allocation7 + $0x30] sm:$0xff]   ;;  %v514_v12 = vld [vmem:[#allocation7 + $0x38] sm:$0xff]  }
  0x4c   :  { %451 = vmatprep.subr.bf16.mxu0 %v623_v0  ;;  %459 = vmatprep.subr.bf16.mxu1 %v623_v0  ;;  %v515_v13 = vld [vmem:[#allocation8] sm:$0xff]   ;;  %v516_v14 = vld [vmem:[#allocation8 + $0x8] sm:$0xff]   ;;  %v517_v15 = vld [vmem:[#allocation8 + $0x10] sm:$0xff]  }
  0x4d   :  { %v518_v16 = vld [vmem:[#allocation8 + $0x18] sm:$0xff]   ;;  %v519_v17 = vld [vmem:[#allocation8 + $0x20] sm:$0xff]   ;;  %v520_v18 = vld [vmem:[#allocation8 + $0x28] sm:$0xff]  }
  0x4e   :  { %v405_v19 = vld [vmem:[%s776_s2] ss:$0 sm:$0xff]  ;;  %v521_v27 = vld [vmem:[#allocation8 + $0x30] sm:$0xff]   ;;  %v522_v28 = vld [vmem:[#allocation8 + $0x38] sm:$0xff]  }
  0x4f   :  { %452 = vmatpush3.bf16.msra.mxu0 %v506_v2  ;;  %460 = vmatpush3.bf16.msra.mxu1 %v508_v6  ;;  %v409_v29 = vld [vmem:[%s778_s4] ss:$0 sm:$0xff] }
  0x50   :  { %477 = vmatprep.subr.bf16.mxu0 %v623_v0  ;;  %461 = vmatprep.subr.bf16.mxu1 %v623_v0  ;;  %v418_v37 = vld [vmem:[%s780_s6] ss:$0 sm:$0xff] }
  0x51   :  { %v427_v42 = vld [vmem:[%s781_s7] ss:$0 sm:$0xff] }
  0x52   :  { %454 = vmatmul.mubr.msk.bf16.vlgmr.msra.gmra.mrb[0].mxu0 %vm112_vm1, %v88_v5 }
  0x53   :  { %493 = vmatprep.mubr.msk.bf16.mxu0 %vm624_vm0, %v623_v0  ;;  %462 = vmatpush3.bf16.msra.mxu1 %v509_v7 }
  0x54   :  { %463 = vmatprep.subr.bf16.mxu1 %v623_v0  ;;  %478 = vmatpush3.bf16.msra.mxu0 %v515_v13 }
  0x55   :  { %479 = vmatprep.subr.bf16.mxu0 %v623_v0 }
  0x57   :  { %464 = vmatpush3.bf16.msra.mxu1 %v510_v8 }
  0x58   :  { %465 = vmatprep.subr.bf16.mxu1 %v623_v0  ;;  %480 = vmatpush3.bf16.msra.mxu0 %v516_v14 }
  0x59   :  { %481 = vmatprep.subr.bf16.mxu0 %v623_v0 }
  0x5b   :  { %466 = vmatpush3.bf16.msra.mxu1 %v511_v9 }
  0x5c   :  { %467 = vmatprep.subr.bf16.mxu1 %v623_v0  ;;  %482 = vmatpush3.bf16.msra.mxu0 %v517_v15 }
  0x5d   :  { %483 = vmatprep.subr.bf16.mxu0 %v623_v0 }
  0x5f   :  { %468 = vmatpush3.bf16.msra.mxu1 %v512_v10 }
  0x60   :  { %469 = vmatprep.subr.bf16.mxu1 %v623_v0  ;;  %484 = vmatpush3.bf16.msra.mxu0 %v518_v16 }
  0x61   :  { %485 = vmatprep.subr.bf16.mxu0 %v623_v0 }
  0x63   :  { %470 = vmatpush3.bf16.msra.mxu1 %v513_v11 }
  0x64   :  { %471 = vmatprep.subr.bf16.mxu1 %v623_v0  ;;  %486 = vmatpush3.bf16.msra.mxu0 %v519_v17 }
  0x65   :  { %487 = vmatprep.subr.bf16.mxu0 %v623_v0 }
  0x67   :  { %472 = vmatpush3.bf16.msra.mxu1 %v514_v12 }
  0x68   :  { %488 = vmatpush3.bf16.msra.mxu0 %v520_v18 }
  0x69   :  { %489 = vmatprep.subr.bf16.mxu0 %v623_v0 }
  0x6c   :  { %490 = vmatpush3.bf16.msra.mxu0 %v521_v27 }
  0x6d   :  { %491 = vmatprep.subr.bf16.mxu0 %v623_v0 }
  0x70   :  { %492 = vmatpush3.bf16.msra.mxu0 %v522_v28 }
 0x125   :  { %v150_v20 = vpop.f32.mrb[0].mxu0 }
 0x126   :  { %v151_v21 = vadd.f32 %v405_v19, %v150_v20  ;;  %v455_v22 = vpop.f32.mrb[1].mxu0 }
 0x127   :  { %v153_v23 = vpop.f32.mrb[2].mxu0 }
 0x128   :  { %v156_v24 = vmax.f32 %v151_v21, 0.0  ;;  %v456_v25 = vpop.f32.mrb[3].mxu0 }
 0x12a   :  { %v157_v26 = vpack.c.bf16 %v156_v24, %v156_v24 }
 0x12c   :  { %474 = vmatmul.mubr.bf16.vlgmr.msra.gmra.mrb[0].mxu1 %v157_v26 }
 0x1ff   :  { %v263_v30 = vpop.f32.mrb[0].mxu1 }
 0x200   :  { %v264_v31 = vadd.f32 %v409_v29, %v263_v30  ;;  %v475_v32 = vpop.f32.mrb[1].mxu1 }
 0x201   :  { %v266_v33 = vpop.f32.mrb[2].mxu1 }
 0x202   :  { %v269_v34 = vmax.f32 %v264_v31, 0.0  ;;  %v476_v35 = vpop.f32.mrb[3].mxu1 }
 0x204   :  { %v270_v36 = vpack.c.bf16 %v269_v34, %v269_v34 }
 0x206   :  { %494 = vmatmul.mubr.bf16.vlgmr.msra.gmra.mrb[4].mxu0 %v270_v36 }
 0x2d9   :  { %v376_v38 = vpop.f32.mrb[4].mxu0 }
 0x2da   :  { %v377_v39 = vadd.f32 %v418_v37, %v376_v38  ;;  %v495_v40 = vpop.f32.mrb[5].mxu0 }
 0x2db   :  { %v379_v41 = vpop.f32.mrb[6].mxu0 }
 0x2dc   :  { %v382_v43 = vmax.f32 %v377_v39, 0.0  ;;  %v496_v44 = vpop.f32.mrb[7].mxu0 }
 0x2de   :  { %v390_v45 = vmul.f32 %v427_v42, %v382_v43 }
 0x2e0   :  { %391 = vadd.xlane.f32.xlu0 %v390_v45 }
 0x36d   :  { %v392_v47 = vpop.xlane.xlu0 %391 }
 0x36e   :  { %v395_v48 = vadd.f32 %v394_v46, %v392_v47 }
 0x370   :  { %397 = vst.msk [vmem:[%s783_s9] sm:$0xff] %vm396_vm2, %v395_v48 }
 0x371   :  { %402 = vsyncpa [#allocation4], 1 }
 0x372   :  { %403 = vsyncpa [#allocation6], 1 }
 0x373   :  { %404 = vsyncpa [#allocation9], 1 }

</bundles_post_ra>
